<compile_context>
chip_gen: v7x
topology: tpu7x:2x2x1
jax: 0.10.0
libtpu: 0.0.40
codegen_flags: <defaults>
</compile_context>

<pallas_src>
import functools

import jax
import jax.numpy as jnp
from jax.experimental import pallas as pl
from jax.experimental.pallas import tpu as pltpu

_EPS = 1e-6     # PyTorch F.pairwise_distance default eps
_GAMMA = 1.0


def _learn_guide_loss_kernel(n_true, apply_mask,
                             classes_ref, target_ref, lr_ref, hr_ref,
                             loss_ref, lc_ref, lf_ref,
                             ce_acc, pd_acc):
    pid = pl.program_id(0)

    @pl.when(pid == 0)
    def _init():
        ce_acc[...] = jnp.zeros_like(ce_acc)
        pd_acc[...] = jnp.zeros_like(pd_acc)

    tn, c = classes_ref.shape

    valid = None
    if apply_mask:
        # Rows >= n_true are wrapper-side zero padding; drop their contributions.
        row_ids = pid * tn + jax.lax.broadcasted_iota(jnp.int32, (tn, 1), 0)
        valid = (row_ids < n_true).astype(jnp.float32)          # (tn, 1)

    # ---- Cross-entropy partial sum --------------------------------------
    logits = classes_ref[...].astype(jnp.float32)                # (tn, c)
    shifted = logits - jnp.max(logits, axis=-1, keepdims=True)   # reused below
    lse_shift = jnp.log(jnp.sum(jnp.exp(shifted), axis=-1, keepdims=True))   # (tn, 1)
    col_ids = jax.lax.broadcasted_iota(jnp.int32, (tn, c), 1)
    picked_shift = jnp.sum(
        jnp.where(col_ids == target_ref[...], shifted, 0.0),
        axis=-1, keepdims=True)                                   # (tn, 1)
    # ce = (lse_shift + rowmax) - (picked_shift + rowmax) = lse_shift - picked_shift
    ce_per_row = lse_shift - picked_shift
    if apply_mask:
        ce_per_row = ce_per_row * valid
    ce_acc[...] += jnp.sum(ce_per_row, axis=(0, 1), keepdims=True)

    # ---- Pairwise L2 distance partial sum --------------------------------
    diff = lr_ref[...].astype(jnp.float32) - hr_ref[...].astype(jnp.float32) + _EPS
    dist = jnp.sqrt(jnp.sum(diff * diff, axis=-1, keepdims=True))  # (tn, 1)
    if apply_mask:
        dist = dist * valid
    pd_acc[...] += jnp.sum(dist, axis=(0, 1), keepdims=True)

    # ---- Finalize: divide by the true N and fuse the final add -----------
    @pl.when(pid == pl.num_programs(0) - 1)
    def _finalize():
        inv_n = 1.0 / n_true
        lc = ce_acc[...] * inv_n                                  # (1, 1)
        lf = pd_acc[...] * inv_n                                  # (1, 1)
        lc_ref[...] = lc
        lf_ref[...] = lf
        loss_ref[...] = lc + _GAMMA * lf


def _choose_row_tile(n, c, d, target_bytes=12 << 20):
    """Pick the batch tile TN from a double-buffered VMEM budget.

    Per row (f32): logits (C lanes) + 2 feature rows (D lanes each) + the int32
    target column, which pads to 128 lanes in VMEM. x2 for double buffering.
    12 MiB keeps us under the 16 MiB v5e scoped-VMEM default and well under the
    32 MiB scoped / 64 MiB physical budget on v7x.
    """
    bytes_per_row = 2 * 4 * (c + 2 * d + 128)
    tn = target_bytes // bytes_per_row
    tn = int(max(8, min(1024, (tn // 8) * 8)))
    n_pad8 = ((n + 7) // 8) * 8
    tn = min(tn, n_pad8)            # never tile wider than the (8-padded) batch
    return max(8, (tn // 8) * 8)


def learn_guide_loss(classes, target, lr_feature, hr_feature):
    """classes: (N, C) float logits; target: (N,) ints; lr/hr_feature: (N, D) floats."""
    n, c = classes.shape
    _, d = lr_feature.shape

    tn = _choose_row_tile(n, c, d)
    num_tiles = pl.cdiv(n, tn)
    n_pad = num_tiles * tn

    target_col = target.astype(jnp.int32).reshape(n, 1)
    classes_p, lr_p, hr_p = classes, lr_feature, hr_feature
    if n_pad != n:
        pad = n_pad - n
        classes_p = jnp.pad(classes_p, ((0, pad), (0, 0)))
        target_col = jnp.pad(target_col, ((0, pad), (0, 0)))
        lr_p = jnp.pad(lr_p, ((0, pad), (0, 0)))
        hr_p = jnp.pad(hr_p, ((0, pad), (0, 0)))

    kernel = functools.partial(_learn_guide_loss_kernel, n, n_pad != n)

    loss, lc, lf = pl.pallas_call(
        kernel,
        out_shape=(
            jax.ShapeDtypeStruct((1, 1), jnp.float32),   # loss
            jax.ShapeDtypeStruct((1, 1), jnp.float32),   # loss_class
            jax.ShapeDtypeStruct((1, 1), jnp.float32),   # loss_feature
        ),
        grid_spec=pltpu.PrefetchScalarGridSpec(
            num_scalar_prefetch=0,
            grid=(num_tiles,),
            in_specs=[
                pl.BlockSpec((tn, c), lambda i: (i, 0)),
                pl.BlockSpec((tn, 1), lambda i: (i, 0)),
                pl.BlockSpec((tn, d), lambda i: (i, 0)),
                pl.BlockSpec((tn, d), lambda i: (i, 0)),
            ],
            out_specs=[
                pl.BlockSpec((1, 1), lambda i: (0, 0)),
                pl.BlockSpec((1, 1), lambda i: (0, 0)),
                pl.BlockSpec((1, 1), lambda i: (0, 0)),
            ],
            scratch_shapes=[
                pltpu.VMEM((1, 1), jnp.float32),   # running CE sum
                pltpu.VMEM((1, 1), jnp.float32),   # running distance sum
            ],
        ),
        compiler_params=pltpu.CompilerParams(
            dimension_semantics=("arbitrary",),     # reduction axis w/ persistent scratch
            vmem_limit_bytes=32 * 1024 * 1024,
        ),
    )(classes_p, target_col, lr_p, hr_p)

    return loss[0, 0], lc[0, 0], lf[0, 0]


if __name__ == "__main__":
    key = jax.random.PRNGKey(0)
    k1, k2, k3, k4 = jax.random.split(key, 4)

    N, C, D = 8, 16, 32
    classes = jax.random.normal(k1, (N, C), dtype=jnp.float32)
    target = jax.random.randint(k2, (N,), 0, C, dtype=jnp.int32)
    lr_feature = jax.random.normal(k3, (N, D), dtype=jnp.float32)
    hr_feature = jax.random.normal(k4, (N, D), dtype=jnp.float32)

    loss, loss_class, loss_feature = learn_guide_loss(
        classes, target, lr_feature, hr_feature)
    jax.block_until_ready((loss, loss_class, loss_feature))

    # Pure-JAX reference (log-softmax CE + L2 pairwise distance with torch's eps).
    logz = jax.nn.logsumexp(classes, axis=-1)
    ce_ref = jnp.mean(logz - classes[jnp.arange(N), target])
    pd_ref = jnp.mean(jnp.sqrt(jnp.sum(
        (lr_feature - hr_feature + _EPS) ** 2, axis=-1)))
    loss_ref = ce_ref + pd_ref * _GAMMA
    assert jnp.allclose(loss_class, ce_ref, rtol=1e-5, atol=1e-5)
    assert jnp.allclose(loss_feature, pd_ref, rtol=1e-5, atol=1e-5)
    assert jnp.allclose(loss, loss_ref, rtol=1e-5, atol=1e-5)

    print("KERNEL_OK")
</pallas_src>

<mosaic_0001>
module attributes {stable_mosaic.version = 11 : i64} {
  func.func @_learn_guide_loss_kernel(%arg0: i32, %arg1: memref<8x16xf32, #tpu.memory_space<vmem>>, %arg2: memref<8x1xi32, #tpu.memory_space<vmem>>, %arg3: memref<8x32xf32, #tpu.memory_space<vmem>>, %arg4: memref<8x32xf32, #tpu.memory_space<vmem>>, %arg5: memref<1x1xf32, #tpu.memory_space<vmem>>, %arg6: memref<1x1xf32, #tpu.memory_space<vmem>>, %arg7: memref<1x1xf32, #tpu.memory_space<vmem>>, %arg8: memref<1x1xf32, #tpu.memory_space<vmem>>, %arg9: memref<1x1xf32, #tpu.memory_space<vmem>>) attributes {dimension_semantics = [#tpu.dimension_semantics<arbitrary>], iteration_bounds = array<i64: 1>, scalar_prefetch = 0 : i64, scratch_operands = 2 : i64, tpu.core_type = #tpu.core_type<tc>, window_params = [{transform_indices = @transform_0, window_bounds = array<i64: 8, 16>}, {transform_indices = @transform_1, window_bounds = array<i64: 8, 1>}, {transform_indices = @transform_2, window_bounds = array<i64: 8, 32>}, {transform_indices = @transform_3, window_bounds = array<i64: 8, 32>}, {pipeline_mode = #tpu.pipeline_mode<synchronous>, transform_indices = @transform_4, window_bounds = array<i64: 1, 1>}, {pipeline_mode = #tpu.pipeline_mode<synchronous>, transform_indices = @transform_5, window_bounds = array<i64: 1, 1>}, {pipeline_mode = #tpu.pipeline_mode<synchronous>, transform_indices = @transform_6, window_bounds = array<i64: 1, 1>}]} {
    %c0_i32 = arith.constant 0 : i32
    %0 = arith.cmpi eq, %arg0, %c0_i32 : i32
    %1 = arith.extui %0 : i1 to i32
    %c0_i32_0 = arith.constant 0 : i32
    %2 = arith.cmpi ne, %1, %c0_i32_0 : i32
    scf.if %2 {
      %cst_25 = arith.constant 0.000000e+00 : f32
      %49 = vector.broadcast %cst_25 : f32 to vector<1x1xf32>
      %c0_26 = arith.constant 0 : index
      %c0_27 = arith.constant 0 : index
      %50 = vector.load %arg8[%c0_26, %c0_27] : memref<1x1xf32, #tpu.memory_space<vmem>>, vector<1x1xf32>
      tpu.vector_store %arg8[%c0_26, %c0_27], %49 {strides = array<i32>} : memref<1x1xf32, #tpu.memory_space<vmem>>, vector<1x1xf32>,
      %cst_28 = arith.constant 0.000000e+00 : f32
      %51 = vector.broadcast %cst_28 : f32 to vector<1x1xf32>
      %c0_29 = arith.constant 0 : index
      %c0_30 = arith.constant 0 : index
      %52 = vector.load %arg9[%c0_29, %c0_30] : memref<1x1xf32, #tpu.memory_space<vmem>>, vector<1x1xf32>
      tpu.vector_store %arg9[%c0_29, %c0_30], %51 {strides = array<i32>} : memref<1x1xf32, #tpu.memory_space<vmem>>, vector<1x1xf32>,
    } else {
    }
    %c0 = arith.constant 0 : index
    %c0_1 = arith.constant 0 : index
    %3 = vector.load %arg1[%c0, %c0_1] : memref<8x16xf32, #tpu.memory_space<vmem>>, vector<8x16xf32>
    %cst = arith.constant dense<0xFF800000> : vector<8xf32>
    %4 = vector.multi_reduction <maximumf>, %3, %cst [1] : vector<8x16xf32> to vector<8xf32>
    %5 = vector.shape_cast %4 : vector<8xf32> to vector<8x1xf32>
    %6 = vector.broadcast %5 : vector<8x1xf32> to vector<8x16xf32>
    %7 = arith.subf %3, %6 : vector<8x16xf32>
    %8 = math.exp %7 : vector<8x16xf32>
    %cst_2 = arith.constant dense<0.000000e+00> : vector<8xf32>
    %9 = vector.multi_reduction <add>, %8, %cst_2 [1] : vector<8x16xf32> to vector<8xf32>
    %10 = vector.shape_cast %9 : vector<8xf32> to vector<8x1xf32>
    %11 = math.log %10 : vector<8x1xf32>
    %12 = tpu.iota {dimensions = array<i32: 1>} : vector<8x16xi32>
    %c0_3 = arith.constant 0 : index
    %c0_4 = arith.constant 0 : index
    %13 = vector.load %arg2[%c0_3, %c0_4] : memref<8x1xi32, #tpu.memory_space<vmem>>, vector<8x1xi32>
    %14 = vector.broadcast %13 : vector<8x1xi32> to vector<8x16xi32>
    %15 = arith.cmpi eq, %12, %14 : vector<8x16xi32>
    %cst_5 = arith.constant 0.000000e+00 : f32
    %16 = vector.broadcast %cst_5 : f32 to vector<8x16xf32>
    %17 = arith.select %15, %7, %16 : vector<8x16xi1>, vector<8x16xf32>
    %cst_6 = arith.constant dense<0.000000e+00> : vector<8xf32>
    %18 = vector.multi_reduction <add>, %17, %cst_6 [1] : vector<8x16xf32> to vector<8xf32>
    %19 = vector.shape_cast %18 : vector<8xf32> to vector<8x1xf32>
    %20 = arith.subf %11, %19 : vector<8x1xf32>
    %c0_7 = arith.constant 0 : index
    %c0_8 = arith.constant 0 : index
    %21 = vector.load %arg8[%c0_7, %c0_8] : memref<1x1xf32, #tpu.memory_space<vmem>>, vector<1x1xf32>
    %22 = vector.shape_cast %20 : vector<8x1xf32> to vector<1x8x1xf32>
    %cst_9 = arith.constant dense<0.000000e+00> : vector<1xf32>
    %23 = vector.multi_reduction <add>, %22, %cst_9 [1, 2] : vector<1x8x1xf32> to vector<1xf32>
    %24 = vector.shape_cast %23 : vector<1xf32> to vector<1x1x1xf32>
    %25 = vector.extract %24[0, 0, 0] : f32 from vector<1x1x1xf32>
    %26 = vector.broadcast %25 : f32 to vector<1x1xf32>
    %27 = arith.addf %21, %26 : vector<1x1xf32>
    %c0_10 = arith.constant 0 : index
    %c0_11 = arith.constant 0 : index
    %28 = vector.load %arg8[%c0_10, %c0_11] : memref<1x1xf32, #tpu.memory_space<vmem>>, vector<1x1xf32>
    tpu.vector_store %arg8[%c0_10, %c0_11], %27 {strides = array<i32>} : memref<1x1xf32, #tpu.memory_space<vmem>>, vector<1x1xf32>,
    %c0_12 = arith.constant 0 : index
    %c0_13 = arith.constant 0 : index
    %29 = vector.load %arg3[%c0_12, %c0_13] : memref<8x32xf32, #tpu.memory_space<vmem>>, vector<8x32xf32>
    %c0_14 = arith.constant 0 : index
    %c0_15 = arith.constant 0 : index
    %30 = vector.load %arg4[%c0_14, %c0_15] : memref<8x32xf32, #tpu.memory_space<vmem>>, vector<8x32xf32>
    %31 = arith.subf %29, %30 : vector<8x32xf32>
    %cst_16 = arith.constant 9.99999997E-7 : f32
    %32 = vector.broadcast %cst_16 : f32 to vector<8x32xf32>
    %33 = arith.addf %31, %32 : vector<8x32xf32>
    %34 = arith.mulf %33, %33 : vector<8x32xf32>
    %cst_17 = arith.constant dense<0.000000e+00> : vector<8xf32>
    %35 = vector.multi_reduction <add>, %34, %cst_17 [1] : vector<8x32xf32> to vector<8xf32>
    %36 = vector.shape_cast %35 : vector<8xf32> to vector<8x1xf32>
    %37 = math.sqrt %36 : vector<8x1xf32>
    %c0_18 = arith.constant 0 : index
    %c0_19 = arith.constant 0 : index
    %38 = vector.load %arg9[%c0_18, %c0_19] : memref<1x1xf32, #tpu.memory_space<vmem>>, vector<1x1xf32>
    %39 = vector.shape_cast %37 : vector<8x1xf32> to vector<1x8x1xf32>
    %cst_20 = arith.constant dense<0.000000e+00> : vector<1xf32>
    %40 = vector.multi_reduction <add>, %39, %cst_20 [1, 2] : vector<1x8x1xf32> to vector<1xf32>
    %41 = vector.shape_cast %40 : vector<1xf32> to vector<1x1x1xf32>
    %42 = vector.extract %41[0, 0, 0] : f32 from vector<1x1x1xf32>
    %43 = vector.broadcast %42 : f32 to vector<1x1xf32>
    %44 = arith.addf %38, %43 : vector<1x1xf32>
    %c0_21 = arith.constant 0 : index
    %c0_22 = arith.constant 0 : index
    %45 = vector.load %arg9[%c0_21, %c0_22] : memref<1x1xf32, #tpu.memory_space<vmem>>, vector<1x1xf32>
    tpu.vector_store %arg9[%c0_21, %c0_22], %44 {strides = array<i32>} : memref<1x1xf32, #tpu.memory_space<vmem>>, vector<1x1xf32>,
    %c0_i32_23 = arith.constant 0 : i32
    %46 = arith.cmpi eq, %arg0, %c0_i32_23 : i32
    %47 = arith.extui %46 : i1 to i32
    %c0_i32_24 = arith.constant 0 : i32
    %48 = arith.cmpi ne, %47, %c0_i32_24 : i32
    scf.if %48 {
      %c0_25 = arith.constant 0 : index
      %c0_26 = arith.constant 0 : index
      %49 = vector.load %arg8[%c0_25, %c0_26] : memref<1x1xf32, #tpu.memory_space<vmem>>, vector<1x1xf32>
      %cst_27 = arith.constant 1.250000e-01 : f32
      %50 = vector.broadcast %cst_27 : f32 to vector<1x1xf32>
      %51 = arith.mulf %49, %50 : vector<1x1xf32>
      %c0_28 = arith.constant 0 : index
      %c0_29 = arith.constant 0 : index
      %52 = vector.load %arg9[%c0_28, %c0_29] : memref<1x1xf32, #tpu.memory_space<vmem>>, vector<1x1xf32>
      %cst_30 = arith.constant 1.250000e-01 : f32
      %53 = vector.broadcast %cst_30 : f32 to vector<1x1xf32>
      %54 = arith.mulf %52, %53 : vector<1x1xf32>
      %c0_31 = arith.constant 0 : index
      %c0_32 = arith.constant 0 : index
      %55 = vector.load %arg6[%c0_31, %c0_32] : memref<1x1xf32, #tpu.memory_space<vmem>>, vector<1x1xf32>
      tpu.vector_store %arg6[%c0_31, %c0_32], %51 {strides = array<i32>} : memref<1x1xf32, #tpu.memory_space<vmem>>, vector<1x1xf32>,
      %c0_33 = arith.constant 0 : index
      %c0_34 = arith.constant 0 : index
      %56 = vector.load %arg7[%c0_33, %c0_34] : memref<1x1xf32, #tpu.memory_space<vmem>>, vector<1x1xf32>
      tpu.vector_store %arg7[%c0_33, %c0_34], %54 {strides = array<i32>} : memref<1x1xf32, #tpu.memory_space<vmem>>, vector<1x1xf32>,
      %cst_35 = arith.constant 1.000000e+00 : f32
      %57 = vector.broadcast %cst_35 : f32 to vector<1x1xf32>
      %58 = arith.mulf %57, %54 : vector<1x1xf32>
      %59 = arith.addf %51, %58 : vector<1x1xf32>
      %c0_36 = arith.constant 0 : index
      %c0_37 = arith.constant 0 : index
      %60 = vector.load %arg5[%c0_36, %c0_37] : memref<1x1xf32, #tpu.memory_space<vmem>>, vector<1x1xf32>
      tpu.vector_store %arg5[%c0_36, %c0_37], %59 {strides = array<i32>} : memref<1x1xf32, #tpu.memory_space<vmem>>, vector<1x1xf32>,
    } else {
    }
    return
  }
  func.func @transform_0(%arg0: i32) -> (i32, i32) {
    %c0_i32 = arith.constant 0 : i32
    %c0_i32_0 = arith.constant 0 : i32
    return %arg0, %c0_i32 : i32, i32
  }
  func.func @transform_1(%arg0: i32) -> (i32, i32) {
    %c0_i32 = arith.constant 0 : i32
    %c0_i32_0 = arith.constant 0 : i32
    return %arg0, %c0_i32 : i32, i32
  }
  func.func @transform_2(%arg0: i32) -> (i32, i32) {
    %c0_i32 = arith.constant 0 : i32
    %c0_i32_0 = arith.constant 0 : i32
    return %arg0, %c0_i32 : i32, i32
  }
  func.func @transform_3(%arg0: i32) -> (i32, i32) {
    %c0_i32 = arith.constant 0 : i32
    %c0_i32_0 = arith.constant 0 : i32
    return %arg0, %c0_i32 : i32, i32
  }
  func.func @transform_4(%arg0: i32) -> (i32, i32) {
    %c0_i32 = arith.constant 0 : i32
    %c0_i32_0 = arith.constant 0 : i32
    %c0_i32_1 = arith.constant 0 : i32
    return %c0_i32, %c0_i32_0 : i32, i32
  }
  func.func @transform_5(%arg0: i32) -> (i32, i32) {
    %c0_i32 = arith.constant 0 : i32
    %c0_i32_0 = arith.constant 0 : i32
    %c0_i32_1 = arith.constant 0 : i32
    return %c0_i32, %c0_i32_0 : i32, i32
  }
  func.func @transform_6(%arg0: i32) -> (i32, i32) {
    %c0_i32 = arith.constant 0 : i32
    %c0_i32_0 = arith.constant 0 : i32
    %c0_i32_1 = arith.constant 0 : i32
    return %c0_i32, %c0_i32_0 : i32, i32
  }
}

</mosaic_0001>

<bundles_post_ra>
// kernel: tpu_custom_call.1
= control target key start
LH: loop header
LB: loop body
LE: loop exit
PB: predicated region body
PF: predicated region fallthrough
CT: control target
= control target key end

     0   :  { %12 = vsyncpa [#allocation5], 0  ;;  %s392_s0 = inlined_call_operand.vmem [shape: f32[8,16], index: 0, kind: input, shape index: {}]   ;;  %s393_s1 = inlined_call_operand.vmem [shape: s32[8,1], index: 1, kind: input, shape index: {}]   ;;  %s394_s2 = inlined_call_operand.vmem [shape: f32[8,32], index: 2, kind: input, shape index: {}]   ;;  %s395_s3 = inlined_call_operand.hbm [shape: f32[8,32], index: 3, kind: input, shape index: {}]   ;;  %s396_s4 = inlined_call_operand.hbm [shape: f32[1,1], index: 4, kind: output, shape index: {0}]   ;;  %s397_s5 = inlined_call_operand.hbm [shape: f32[1,1], index: 5, kind: output, shape index: {1}]   ;;  %s398_s6 = inlined_call_operand.hbm [shape: f32[1,1], index: 6, kind: output, shape index: {2}]  }
   0x1   :  { %13 = vsyncpa [#allocation6], 0 }
   0x2   :  { %14 = vsyncpa [#allocation9], 0  ;;  %s276_s21 = smov [#allocation4]   ;;  %s182_s25 = scalar_lea.hbm %s395_s3, 128 }
   0x3   :  { %s27_s22 = sshll.u32 %s276_s21, 4  ;;  %p183_p0 = scmp.ne.s32.totalorder %s395_s3, %s182_s25  ;;  %s28_s22 = int_to_ptr.vmem [resolvable:$true] %s27_s22 }
   0x4   :  { %p186_p1 = scmp.lt.u32.totalorder %s182_s25, %s395_s3 }
   0x6   :  { %p188_p2 = pnand %p186_p1, %p183_p0 }
   0x8   :  { %191 = shalt.err (!%p188_p2)
}
   0x9   :  { %s192_s30 = scalar_lea.vmem %s28_s22, 128  ;;  %p197_p4 = scmp.lt.s32.totalorder %s28_s22, %s28_s22 }
   0xa   :  { %p193_p3 = scmp.ne.s32.totalorder %s28_s22, %s192_s30  ;;  %p198_p5 = scmp.lt.s32.totalorder %s192_s30, %s192_s30 }
   0xc   :  { %p199_p6 = por %p198_p5, %p197_p4 }
   0xe   :  { %p200_p7 = pnand %p199_p6, %p193_p3 }
  0x10   :  { %203 = shalt.err (!%p200_p7)
}
  0x11   :  { %30 = dma.hbm_to_vmem [thread:$0]  %s395_s3, 128, %s28_s22, [#allocation5]  }
  0x12   :  { %270 = dma.done.wait [#allocation5], 128  }
  0x13   :  { %271 = vsyncadd [#allocation5], 4294967168  ;;  %v277_v0 = vmov 0   ;;  %vm42_vm0 = vcmask 130048   ;;  %v41_v1 = vld [vmem:[%s392_s0] sm:$0xff]  ;;  %v54_v10 = vlaneseq  ;;  %vm87_vm1 = vcmask 261120  }
  0x14   :  { %175 = vset.pattern.permute.xlu0 %v277_v0  ;;  %v43_v2 = vsel %vm42_vm0, %v41_v1, -inf  ;;  %v56_v3 = vld [vmem:[%s393_s1] sm:$0xff]  ;;  %vm67_vm3 = vcmask 7168   ;;  %vm38_vm6 = vcmask 0   ;;  %v278_v33 = vmov 0.0   ;;  %s280_s15 = smov [#allocation10]  }
  0x15   :  { %44 = vmax.xlane.f32.xlu0 %v43_v2  ;;  %v82_v7 = vld [vmem:[%s394_s2] sm:$0xff]  ;;  %v55_v12 = vand.u32 127, %v54_v10  ;;  %39 = vst.msk [vmem:[#allocation2] sm:$0x1] %vm38_vm6, %v278_v33  ;;  %40 = vst.msk [vmem:[#allocation3] sm:$0x1] %vm38_vm6, %v278_v33 }
  0x16   :  { %v83_v8 = vld [vmem:[#allocation4] sm:$0xff]  ;;  %s279_s2 = smov [#allocation8]   ;;  %s149_s16 = sshll.u32 %s280_s15, 4  ;;  %s150_s16 = int_to_ptr.vmem [resolvable:$true] %s149_s16 }
  0x17   :  { %v84_v9 = vsub.f32 %v82_v7, %v83_v8  ;;  %s139_s14 = sshll.u32 %s279_s2, 4  ;;  %s281_s17 = smov [#allocation7]   ;;  %s140_s14 = int_to_ptr.vmem [resolvable:$true] %s139_s14 }
  0x18   :  { %s129_s18 = sshll.u32 %s281_s17, 4  ;;  %s204_s19 = scalar_lea.vmem %s140_s14, 16  ;;  %s358_s18 = int_to_ptr.vmem [resolvable:$true] %s129_s18 }
  0x19   :  { %v85_v11 = vadd.f32 1e-06, %v84_v9  ;;  %p205_p8 = scmp.ne.s32.totalorder %s140_s14, %s204_s19  ;;  %s208_s20 = scalar_lea.vmem %s140_s14, 32 }
  0x1a   :  { %p209_p9 = scmp.lt.s32.totalorder %s140_s14, %s140_s14  ;;  %p210_p10 = scmp.lt.s32.totalorder %s208_s20, %s204_s19 }
  0x1b   :  { %v86_v13 = vmul.f32 %v85_v11, %v85_v11 }
  0x1c   :  { %v66_v48 = vld [vmem:[#allocation2] sm:$0x1]  ;;  %v98_v51 = vld [vmem:[#allocation3] sm:$0x1]  ;;  %p211_p11 = por %p210_p10, %p209_p9 }
  0x1d   :  { %v88_v17 = vsel %vm87_vm1, %v86_v13, 0.0 }
  0x1e   :  { %p212_p12 = pnand %p211_p11, %p205_p8 }
  0x2b   :  { %58 = vperm.xlu0 %175, %v56_v3  }
  0xa2   :  { %v45_v4 = vpop.xlane.xlu0 %44 }
  0xa3   :  { %v46_v5 = vsub.f32 %v41_v1, %v45_v4 }
  0xa5   :  { %v47_v6 = vmul.f32 1.442695, %v46_v5 }
  0xa7   :  { %176 = vpow2.f32 %v47_v6 }
  0xaa   :  { %v59_v15 = vpop.permute.xlu0 %58 }
  0xab   :  { %vm60_vm2 = vcmp.eq.s32.totalorder %v55_v12, %v59_v15 }
  0xac   :  { %v61_v18 = vsel %vm60_vm2, %v46_v5, 0.0 }
  0xad   :  { %v62_v19 = vsel %vm42_vm0, %v61_v18, 0.0 }
  0xb1   :  { %v177_v14 = vpop.eup %176 }
  0xb2   :  { %v49_v16 = vsel %vm42_vm0, %v177_v14, 0.0 }
  0xb3   :  { %50 = vadd.xlane.f32.xlu1 %v49_v16 }
  0xb7   :  { %89 = vadd.xlane.f32.xlu1 %v88_v17 }
  0xbb   :  { %63 = vadd.xlane.f32.xlu1 %v62_v19 }
 0x140   :  { %v51_v20 = vpop.xlane.xlu1 %50 }
 0x141   :  { %178 = vlog2.f32 %v51_v20 }
 0x144   :  { %v90_v21 = vpop.xlane.xlu1 %89 }
 0x145   :  { %180 = vrsqrt.f32 %v90_v21  ;;  %vm93_vm4 = vcmp.eq.f32.partialorder %v90_v21, inf  ;;  %v96_v29 = vand.u32 2147483648, %v90_v21  ;;  %vm95_vm5 = vcmp.eq.f32.partialorder %v90_v21, 0.0 }
 0x148   :  { %v64_v24 = vpop.xlane.xlu1 %63 }
 0x14b   :  { %v179_v22 = vpop.eup %178 }
 0x14c   :  { %v53_v23 = vmul.f32 0.6931472, %v179_v22 }
 0x14e   :  { %v65_v25 = vsub.f32 %v53_v23, %v64_v24 }
 0x14f   :  { %v181_v26 = vpop.eup %180 }
 0x150   :  { %v68_v27 = vsel %vm67_vm3, %v65_v25, 0.0  ;;  %v92_v28 = vmul.f32 %v181_v26, %v90_v21 }
 0x151   :  { %69 = vadd.xlane.f32.xlu1 %v68_v27 }
 0x152   :  { %v94_v30 = vsel %vm93_vm4, %v90_v21, %v92_v28 }
 0x153   :  { %v97_v31 = vsel %vm95_vm5, %v96_v29, %v94_v30 }
 0x154   :  { %v99_v32 = vsel %vm67_vm3, %v97_v31, 0.0 }
 0x155   :  { %100 = vadd.xlane.f32.xlu1 %v99_v32 }
 0x1de   :  { %v70_v34 = vpop.xlane.xlu1 %69 }
 0x1df   :  { %v71_v35 = vrot.slane %v70_v34, 4 }
 0x1e1   :  { %v72_v36 = vadd.f32 %v71_v35, %v70_v34 }
 0x1e2   :  { %v101_v37 = vpop.xlane.xlu1 %100 }
 0x1e3   :  { %v73_v38 = vrot.slane %v72_v36, 2  ;;  %v102_v39 = vrot.slane %v101_v37, 4 }
 0x1e5   :  { %v103_v40 = vadd.f32 %v102_v39, %v101_v37  ;;  %v74_v41 = vadd.f32 %v73_v38, %v72_v36 }
 0x1e7   :  { %v104_v42 = vrot.slane %v103_v40, 2  ;;  %v75_v43 = vrot.slane %v74_v41, 1 }
 0x1e9   :  { %v105_v44 = vadd.f32 %v104_v42, %v103_v40  ;;  %v76_v45 = vadd.f32 %v75_v43, %v74_v41 }
 0x1eb   :  { %165 = vpush %v76_v45  ;;  %v106_v46 = vrot.slane %v105_v44, 1 }
 0x1ed   :  { %v107_v47 = vadd.f32 %v106_v46, %v105_v44 }
 0x1ef   :  { %167 = vpush %v107_v47 }
 0x21c   :  { %s166_s0 = spop %165 }
 0x21d   :  { %v78_v49 = vstv %s166_s0 }
 0x21e   :  { %v79_v50 = vadd.f32 %v78_v49, %v66_v48 }
 0x220   :  { %81 = vst.msk [vmem:[#allocation2] sm:$0x1] %vm38_vm6, %v79_v50  ;;  %s168_s1 = spop %167 }
 0x221   :  { %v109_v52 = vstv %s168_s1 }
 0x222   :  { %v110_v53 = vadd.f32 %v109_v52, %v98_v51 }
 0x224   :  { %111 = vst.msk [vmem:[#allocation3] sm:$0x1] %vm38_vm6, %v110_v53 }
 0x227   :  { %v115_v54 = vld [vmem:[#allocation2] sm:$0x1] }
 0x228   :  { %v116_v55 = vmul.f32 0.125, %v115_v54 }
 0x22a   :  { %119 = vst.msk [vmem:[#allocation8] sm:$0x1] %vm38_vm6, %v116_v55 }
 0x22b   :  { %215 = shalt.err (!%p212_p12)
}
 0x22c   :  { %s216_s23 = scalar_lea.hbm %s397_s5, 16 }
 0x22d   :  { %p217_p13 = scmp.ne.s32.totalorder %s397_s5, %s216_s23  ;;  %p220_p0 = scmp.lt.u32.totalorder %s216_s23, %s397_s5 }
 0x22f   :  { %p222_p1 = pnand %p220_p0, %p217_p13 }
 0x231   :  { %225 = shalt.err (!%p222_p1)
}
 0x232   :  { %142 = dma.vmem_to_hbm [thread:$0]  %s140_s14, 16, %s397_s5, [#allocation9]   ;;  %v117_v56 = vld [vmem:[#allocation3] sm:$0x1] }
 0x233   :  { %v118_v57 = vmul.f32 0.125, %v117_v56  ;;  %s226_s30 = scalar_lea.vmem %s150_s16, 16  ;;  %s230_s7 = scalar_lea.vmem %s150_s16, 32 }
 0x234   :  { %p227_p2 = scmp.ne.s32.totalorder %s150_s16, %s226_s30  ;;  %p231_p3 = scmp.lt.s32.totalorder %s150_s16, %s150_s16 }
 0x235   :  { %v121_v58 = vadd.f32 %v118_v57, %v116_v55  ;;  %120 = vst.msk [vmem:[#allocation10] sm:$0x1] %vm38_vm6, %v118_v57  ;;  %p232_p4 = scmp.lt.s32.totalorder %s230_s7, %s226_s30 }
 0x237   :  { %p233_p5 = por %p232_p4, %p231_p3 }
 0x239   :  { %p234_p6 = pnand %p233_p5, %p227_p2 }
 0x23b   :  { %237 = shalt.err (!%p234_p6)
}
 0x23c   :  { %s238_s5 = scalar_lea.hbm %s398_s6, 16 }
 0x23d   :  { %p239_p7 = scmp.ne.s32.totalorder %s398_s6, %s238_s5  ;;  %p242_p8 = scmp.lt.u32.totalorder %s238_s5, %s398_s6 }
 0x23f   :  { %p244_p9 = pnand %p242_p8, %p239_p7 }
 0x241   :  { %247 = shalt.err (!%p244_p9)
}
 0x242   :  { %152 = dma.vmem_to_hbm [thread:$0]  %s150_s16, 16, %s398_s6, [#allocation9]   ;;  %122 = vst.msk [vmem:[#allocation7] sm:$0x1] %vm38_vm6, %v121_v58 }
 0x243   :  { %s248_s1 = scalar_lea.vmem %s358_s18, 16  ;;  %s252_s2 = scalar_lea.vmem %s358_s18, 32 }
 0x244   :  { %p249_p10 = scmp.ne.s32.totalorder %s358_s18, %s248_s1  ;;  %p253_p11 = scmp.lt.s32.totalorder %s358_s18, %s358_s18 }
 0x245   :  { %p254_p12 = scmp.lt.s32.totalorder %s252_s2, %s248_s1 }
 0x247   :  { %p255_p13 = por %p254_p12, %p253_p11 }
 0x249   :  { %p256_p0 = pnand %p255_p13, %p249_p10 }
 0x24b   :  { %259 = shalt.err (!%p256_p0)
}
 0x24c   :  { %s260_s17 = scalar_lea.hbm %s396_s4, 16 }
 0x24d   :  { %p261_p1 = scmp.ne.s32.totalorder %s396_s4, %s260_s17  ;;  %p264_p2 = scmp.lt.u32.totalorder %s260_s17, %s396_s4 }
 0x24f   :  { %p266_p3 = pnand %p264_p2, %p261_p1 }
 0x251   :  { %269 = shalt.err (!%p266_p3)
}
 0x252   :  { %132 = dma.vmem_to_hbm [thread:$0]  %s358_s18, 16, %s396_s4, [#allocation6]  }
 0x253   :  { %272 = dma.done.wait [#allocation6], 16  }
 0x254   :  { %273 = vsyncadd [#allocation6], 4294967280 }
 0x255   :  { %274 = dma.done.wait [#allocation9], 32  }
 0x256   :  { %275 = vsyncadd [#allocation9], 4294967264 }
 0x257   :  { %162 = vsyncpa [#allocation5], 1 }
 0x258   :  { %163 = vsyncpa [#allocation6], 1 }
 0x259   :  { %164 = vsyncpa [#allocation9], 1 }

</bundles_post_ra>
